<compile_context>
chip_gen: v7x
topology: tpu7x:2x2x1
jax: 0.10.0
libtpu: 0.0.40
codegen_flags: <defaults>
</compile_context>

<pallas_src>
import math

import jax
import jax.numpy as jnp
from jax.experimental import pallas as pl
from jax.experimental.pallas import tpu as pltpu


# ---------------------------------------------------------------------------
# Kernels
# ---------------------------------------------------------------------------

def _kernel_lane_aligned(x_ref, o_ref):
    # D % 128 == 0: both halves start at a 128-lane-aligned column offset, so
    # two full, unmasked sliced stores; no concatenated intermediate.
    x = x_ref[...]
    d = x.shape[-1]
    zero = jnp.zeros((), dtype=x.dtype)
    o_ref[:, :d] = jnp.maximum(x, zero)
    o_ref[:, d:] = jnp.maximum(-x, zero)


def _kernel_concat(x_ref, o_ref):
    # D % 128 != 0: emit one full-width (rt, 2*D) store.  Output stays 2-D
    # (no (2, D) minor-tile inflation, no post-kernel relayout).
    x = x_ref[...]
    zero = jnp.zeros((), dtype=x.dtype)
    o_ref[...] = jnp.concatenate(
        [jnp.maximum(x, zero), jnp.maximum(-x, zero)], axis=-1
    )


# ---------------------------------------------------------------------------
# Wrapper
# ---------------------------------------------------------------------------

_MAX_ROW_TILE = 8192


def _round_up(n, m):
    return -(-n // m) * m


def _hw_config():
    """Generation-aware (vmem_budget, vmem_limit, dimension_semantics)."""
    kind = ""
    try:
        kind = jax.devices()[0].device_kind.lower()
    except Exception:  # pragma: no cover - defensive; fall back to safe values
        pass

    if "v7" in kind:
        # v7x: 64 MiB VMEM per TC, 2 TCs/chip -> stay conservative, but shard
        # the grid across both cores.
        budget = 16 * 1024 * 1024
        limit = 32 * 1024 * 1024
        if hasattr(pltpu, "CORE_PARALLEL"):
            dims = (pltpu.CORE_PARALLEL,)
        else:
            dims = ("parallel",)
    else:
        # v5e / v6e: 128 MiB physical VMEM -> larger steps, raised scoped limit.
        budget = 48 * 1024 * 1024
        limit = 64 * 1024 * 1024
        dims = ("parallel",)
    return budget, limit, dims


def two_sided_relu(x):
    """Pallas TPU implementation of torch.cat([relu(x), relu(-x)], dim=-1)."""
    orig_shape = x.shape
    d = orig_shape[-1]
    rows = int(math.prod(orig_shape[:-1])) if len(orig_shape) > 1 else 1
    x2d = x.reshape(rows, d)

    itemsize = jnp.dtype(x.dtype).itemsize
    # dtype-aware sublane multiple: 8 (f32), 16 (bf16/f16), 32 (int8/fp8).
    sub = max(8, 32 // itemsize)

    budget, vmem_limit, dims = _hw_config()

    # Row tile sized from the byte budget: (d in + 2d out) per row, x2 for
    # double buffering; rounded to the sublane multiple; never (much) larger
    # than the row count.
    bytes_per_row = 3 * d * itemsize * 2
    rt = max(sub, budget // bytes_per_row)
    rt = min(rt, _MAX_ROW_TILE)
    rt = max(sub, (rt // sub) * sub)
    rt = min(rt, _round_up(rows, sub))

    # Non-divisible grid: Pallas clips the final partial block (elementwise op,
    # so over-read input rows are harmless and OOB output rows never land).
    grid = (pl.cdiv(rows, rt),)

    kernel = _kernel_lane_aligned if d % 128 == 0 else _kernel_concat

    cost = pl.CostEstimate(
        flops=2 * rows * d,
        transcendentals=0,
        bytes_accessed=3 * rows * d * itemsize,
    )

    out2d = pl.pallas_call(
        kernel,
        out_shape=jax.ShapeDtypeStruct((rows, 2 * d), x.dtype),
        grid_spec=pltpu.PrefetchScalarGridSpec(
            num_scalar_prefetch=0,
            grid=grid,
            in_specs=[pl.BlockSpec((rt, d), lambda i: (i, 0))],
            out_specs=pl.BlockSpec((rt, 2 * d), lambda i: (i, 0)),
        ),
        compiler_params=pltpu.CompilerParams(
            dimension_semantics=dims,
            vmem_limit_bytes=vmem_limit,
        ),
        cost_estimate=cost,
    )(x2d)

    return out2d.reshape(*orig_shape[:-1], 2 * d)


def _reference(x):
    return jnp.concatenate([jnp.maximum(x, 0), jnp.maximum(-x, 0)], axis=-1)


if __name__ == "__main__":
    key = jax.random.PRNGKey(0)

    # Primary case matching the module's generic usage: D not a multiple of
    # 128 -> full-width concat store path.
    x = jax.random.normal(key, (2, 4, 16, 16), dtype=jnp.float32)
    out = two_sided_relu(x)
    jax.block_until_ready(out)
    assert out.shape == (2, 4, 16, 32), out.shape
    assert jnp.allclose(out, _reference(x)), "mismatch vs reference (small-D)"

    # Lane-aligned case (D multiple of 128) -> sliced-store path.
    x1 = jax.random.normal(jax.random.PRNGKey(1), (2, 8, 128), dtype=jnp.float32)
    out1 = two_sided_relu(x1)
    jax.block_until_ready(out1)
    assert out1.shape == (2, 8, 256), out1.shape
    assert jnp.allclose(out1, _reference(x1)), "mismatch vs reference (aligned)"

    # Ragged rows (rows=15 not a multiple of the 8-sublane tile) exercising
    # partial-block clipping with no wrapper pad/slice.
    x2 = jax.random.normal(jax.random.PRNGKey(2), (3, 5, 96), dtype=jnp.float32)
    out2 = two_sided_relu(x2)
    jax.block_until_ready(out2)
    assert out2.shape == (3, 5, 192), out2.shape
    assert jnp.allclose(out2, _reference(x2)), "mismatch vs reference (ragged)"

    print("KERNEL_OK")
</pallas_src>

<mosaic_0001>
module attributes {stable_mosaic.version = 11 : i64} {
  func.func @_kernel_concat(%arg0: i32, %arg1: memref<128x16xf32, #tpu.memory_space<vmem>>, %arg2: memref<128x32xf32, #tpu.memory_space<vmem>>) attributes {dimension_semantics = [#tpu.dimension_semantics<parallel>], iteration_bounds = array<i64: 1>, scalar_prefetch = 0 : i64, scratch_operands = 0 : i64, tpu.core_type = #tpu.core_type<tc>, window_params = [{transform_indices = @transform_0, window_bounds = array<i64: 128, 16>}, {transform_indices = @transform_1, window_bounds = array<i64: 128, 32>}]} {
    %c0 = arith.constant 0 : index
    %c0_0 = arith.constant 0 : index
    %0 = vector.load %arg1[%c0, %c0_0] : memref<128x16xf32, #tpu.memory_space<vmem>>, vector<128x16xf32>
    %cst = arith.constant 0.000000e+00 : f32
    %1 = vector.broadcast %cst : f32 to vector<128x16xf32>
    %2 = arith.maximumf %0, %1 : vector<128x16xf32>
    %cst_1 = arith.constant 0.000000e+00 : f32
    %3 = vector.broadcast %cst_1 : f32 to vector<128x16xf32>
    %4 = arith.subf %3, %0 : vector<128x16xf32>
    %cst_2 = arith.constant 0.000000e+00 : f32
    %5 = vector.broadcast %cst_2 : f32 to vector<128x16xf32>
    %6 = arith.maximumf %4, %5 : vector<128x16xf32>
    %7 = tpu.concatenate %2, %6 in 1 : vector<128x16xf32>, vector<128x16xf32> -> vector<128x32xf32>
    %c0_3 = arith.constant 0 : index
    %c0_4 = arith.constant 0 : index
    %8 = vector.load %arg2[%c0_3, %c0_4] : memref<128x32xf32, #tpu.memory_space<vmem>>, vector<128x32xf32>
    tpu.vector_store %arg2[%c0_3, %c0_4], %7 {strides = array<i32>} : memref<128x32xf32, #tpu.memory_space<vmem>>, vector<128x32xf32>,
    return
  }
  func.func @transform_0(%arg0: i32) -> (i32, i32) {
    %c0_i32 = arith.constant 0 : i32
    %c0_i32_0 = arith.constant 0 : i32
    return %arg0, %c0_i32 : i32, i32
  }
  func.func @transform_1(%arg0: i32) -> (i32, i32) {
    %c0_i32 = arith.constant 0 : i32
    %c0_i32_0 = arith.constant 0 : i32
    return %arg0, %c0_i32 : i32, i32
  }
}

</mosaic_0001>

<bundles_post_ra>
// kernel: tpu_custom_call.1
= control target key start
LH: loop header
LB: loop body
LE: loop exit
PB: predicated region body
PF: predicated region fallthrough
CT: control target
= control target key end

     0   :  { %6 = vsyncpa [#allocation3], 0  ;;  %s412_s0 = inlined_call_operand.hbm [shape: f32[128,16], index: 0, kind: input, shape index: {}]   ;;  %s413_s1 = inlined_call_operand.hbm [shape: f32[128,32], index: 1, kind: output, shape index: {}]  }
   0x1   :  { %7 = vsyncpa [#allocation4], 0  ;;  %s255_s6 = smov [#allocation2]   ;;  %s207_s10 = scalar_lea.hbm %s412_s0, 2048 }
   0x2   :  { %s13_s7 = sshll.u32 %s255_s6, 4  ;;  %p208_p0 = scmp.ne.s32.totalorder %s412_s0, %s207_s10  ;;  %s14_s7 = int_to_ptr.vmem [resolvable:$true] %s13_s7 }
   0x3   :  { %p211_p1 = scmp.lt.u32.totalorder %s207_s10, %s412_s0 }
   0x5   :  { %p213_p2 = pnand %p211_p1, %p208_p0 }
   0x7   :  { %216 = shalt.err (!%p213_p2)
}
   0x8   :  { %s217_s15 = scalar_lea.vmem %s14_s7, 2048  ;;  %p222_p4 = scmp.lt.s32.totalorder %s14_s7, %s14_s7 }
   0x9   :  { %p218_p3 = scmp.ne.s32.totalorder %s14_s7, %s217_s15  ;;  %p223_p5 = scmp.lt.s32.totalorder %s217_s15, %s217_s15 }
   0xb   :  { %p224_p6 = por %p223_p5, %p222_p4 }
   0xd   :  { %p225_p7 = pnand %p224_p6, %p218_p3 }
   0xf   :  { %228 = shalt.err (!%p225_p7)
}
  0x10   :  { %s256_s16 = smov 128   ;;  %s257_s17 = smov 8  }
  0x11   :  { %19 = dma.hbm_to_vmem [thread:$0]  %s412_s0, 2048, %s14_s7, [#allocation3], %s256_s16, %s256_s16, %s257_s17  }
  0x12   :  { %251 = dma.done.wait [#allocation3], 2048  }
  0x13   :  { %252 = vsyncadd [#allocation3], 4294965248  ;;  %v285_v0 = vld [vmem:[#allocation2 + $0x10] sm:$0xff]  ;;  %v287_v1 = vld [vmem:[#allocation2] sm:$0xff]  ;;  %s258_s0 = smov 16   ;;  %vm151_vm0 = vcmask 130048  }
  0x14   :  { %v289_v2 = vld [vmem:[#allocation2 + $0x18] sm:$0xff]  ;;  %v57_v3 = vsub.f32 0.0, %v285_v0  ;;  %v55_v4 = vsub.f32 0.0, %v287_v1  ;;  %v293_v5 = vld [vmem:[#allocation2 + $0x8] sm:$0xff]  ;;  %v299_v9 = vld [vmem:[#allocation2 + $0x20] sm:$0xff]  ;;  %v41_v48 = vmax.f32 %v285_v0, 0.0 }
  0x15   :  { %v58_v6 = vsub.f32 0.0, %v289_v2  ;;  %v56_v7 = vsub.f32 0.0, %v293_v5  ;;  %v297_v8 = vld [vmem:[#allocation2 + $0x28] sm:$0xff]  ;;  %v59_v15 = vsub.f32 0.0, %v299_v9  ;;  %v305_v16 = vld [vmem:[#allocation2 + $0x38] sm:$0xff]  ;;  %v307_v17 = vld [vmem:[#allocation2 + $0x30] sm:$0xff] }
  0x16   :  { %v73_v10 = vmax.f32 %v57_v3, 0.0  ;;  %v71_v11 = vmax.f32 %v55_v4, 0.0  ;;  %v60_v14 = vsub.f32 0.0, %v297_v8  ;;  %v62_v20 = vsub.f32 0.0, %v305_v16  ;;  %v313_v22 = vld [vmem:[#allocation2 + $0x48] sm:$0xff]  ;;  %v315_v23 = vld [vmem:[#allocation2 + $0x40] sm:$0xff] }
  0x17   :  { %v74_v12 = vmax.f32 %v58_v6, 0.0  ;;  %v72_v13 = vmax.f32 %v56_v7, 0.0  ;;  %v75_v19 = vmax.f32 %v59_v15, 0.0  ;;  %v61_v21 = vsub.f32 0.0, %v307_v17  ;;  %v321_v28 = vld [vmem:[#allocation2 + $0x58] sm:$0xff]  ;;  %v323_v29 = vld [vmem:[#allocation2 + $0x50] sm:$0xff] }
  0x18   :  { %107 = vrot.lane.b32.xlu1 %v73_v10, %s258_s0  ;;  %103 = vrot.lane.b32.xlu0 %v71_v11, %s258_s0  ;;  %v76_v18 = vmax.f32 %v60_v14, 0.0  ;;  %v78_v24 = vmax.f32 %v62_v20, 0.0  ;;  %v64_v26 = vsub.f32 0.0, %v313_v22  ;;  %v63_v27 = vsub.f32 0.0, %v315_v23  ;;  %v329_v34 = vld [vmem:[#allocation2 + $0x68] sm:$0xff]  ;;  %v331_v35 = vld [vmem:[#allocation2 + $0x60] sm:$0xff] }
  0x19   :  { %v77_v25 = vmax.f32 %v61_v21, 0.0  ;;  %v66_v32 = vsub.f32 0.0, %v321_v28  ;;  %v65_v33 = vsub.f32 0.0, %v323_v29  ;;  %v68_v38 = vsub.f32 0.0, %v329_v34  ;;  %v337_v40 = vld [vmem:[#allocation2 + $0x78] sm:$0xff]  ;;  %v339_v41 = vld [vmem:[#allocation2 + $0x70] sm:$0xff] }
  0x1a   :  { %v80_v30 = vmax.f32 %v64_v26, 0.0  ;;  %v79_v31 = vmax.f32 %v63_v27, 0.0  ;;  %v67_v39 = vsub.f32 0.0, %v331_v35  ;;  %v70_v44 = vsub.f32 0.0, %v337_v40  ;;  %s259_s20 = smov [#allocation5]  }
  0x1b   :  { %v82_v36 = vmax.f32 %v66_v32, 0.0  ;;  %v81_v37 = vmax.f32 %v65_v33, 0.0  ;;  %v84_v42 = vmax.f32 %v68_v38, 0.0  ;;  %v69_v45 = vsub.f32 0.0, %v339_v41  ;;  %s190_s21 = sshll.u32 %s259_s20, 4  ;;  %s191_s21 = int_to_ptr.vmem [resolvable:$true] %s190_s21 }
  0x1c   :  { %109 = vrot.lane.b32.xlu1 %v74_v12, %s258_s0  ;;  %105 = vrot.lane.b32.xlu0 %v72_v13, %s258_s0  ;;  %v83_v43 = vmax.f32 %v67_v39, 0.0  ;;  %v86_v46 = vmax.f32 %v70_v44, 0.0  ;;  %v39_v49 = vmax.f32 %v287_v1, 0.0  ;;  %vm168_vm1 = vcmask 261120   ;;  %s229_s22 = scalar_lea.vmem %s191_s21, 2048  ;;  %p234_p9 = scmp.lt.s32.totalorder %s191_s21, %s191_s21 }
  0x1d   :  { %v85_v47 = vmax.f32 %v69_v45, 0.0  ;;  %v42_v54 = vmax.f32 %v289_v2, 0.0  ;;  %v40_v55 = vmax.f32 %v293_v5, 0.0  ;;  %v44_v60 = vmax.f32 %v297_v8, 0.0  ;;  %p230_p8 = scmp.ne.s32.totalorder %s191_s21, %s229_s22  ;;  %p235_p10 = scmp.lt.s32.totalorder %s229_s22, %s229_s22 }
  0x1e   :  { %v43_v61 = vmax.f32 %v299_v9, 0.0  ;;  %v46_v2 = vmax.f32 %v305_v16, 0.0  ;;  %v45_v3 = vmax.f32 %v307_v17, 0.0  ;;  %v48_v8 = vmax.f32 %v313_v22, 0.0 }
  0x1f   :  { %v47_v9 = vmax.f32 %v315_v23, 0.0  ;;  %v50_v14 = vmax.f32 %v321_v28, 0.0  ;;  %v49_v15 = vmax.f32 %v323_v29, 0.0  ;;  %v52_v20 = vmax.f32 %v329_v34, 0.0  ;;  %p236_p11 = por %p235_p10, %p234_p9 }
  0x20   :  { %113 = vrot.lane.b32.xlu1 %v76_v18, %s258_s0  ;;  %111 = vrot.lane.b32.xlu0 %v75_v19, %s258_s0  ;;  %v51_v21 = vmax.f32 %v331_v35, 0.0  ;;  %v54_v26 = vmax.f32 %v337_v40, 0.0  ;;  %v53_v27 = vmax.f32 %v339_v41, 0.0 }
  0x21   :  { %p237_p12 = pnand %p236_p11, %p230_p8 }
  0x24   :  { %117 = vrot.lane.b32.xlu1 %v78_v24, %s258_s0  ;;  %115 = vrot.lane.b32.xlu0 %v77_v25, %s258_s0 }
  0x28   :  { %121 = vrot.lane.b32.xlu1 %v80_v30, %s258_s0  ;;  %119 = vrot.lane.b32.xlu0 %v79_v31, %s258_s0 }
  0x2c   :  { %125 = vrot.lane.b32.xlu1 %v82_v36, %s258_s0  ;;  %123 = vrot.lane.b32.xlu0 %v81_v37, %s258_s0 }
  0x30   :  { %129 = vrot.lane.b32.xlu1 %v84_v42, %s258_s0  ;;  %127 = vrot.lane.b32.xlu0 %v83_v43, %s258_s0 }
  0x34   :  { %133 = vrot.lane.b32.xlu1 %v86_v46, %s258_s0  ;;  %131 = vrot.lane.b32.xlu0 %v85_v47, %s258_s0 }
  0x8a   :  { %v108_v50 = vpop.permute.xlu1 %107  ;;  %v104_v51 = vpop.permute.xlu0 %103 }
  0x8b   :  { %v154_v52 = vsel %vm151_vm0, %v41_v48, %v108_v50  ;;  %v152_v53 = vsel %vm151_vm0, %v39_v49, %v104_v51 }
  0x8c   :  { %171 = vst.msk [vmem:[#allocation5 + $0x10] sm:$0xff] %vm168_vm1, %v154_v52  ;;  %169 = vst.msk [vmem:[#allocation5] sm:$0xff] %vm168_vm1, %v152_v53 }
  0x8e   :  { %v110_v56 = vpop.permute.xlu1 %109  ;;  %v106_v57 = vpop.permute.xlu0 %105 }
  0x8f   :  { %v155_v58 = vsel %vm151_vm0, %v42_v54, %v110_v56  ;;  %v153_v59 = vsel %vm151_vm0, %v40_v55, %v106_v57 }
  0x90   :  { %172 = vst.msk [vmem:[#allocation5 + $0x18] sm:$0xff] %vm168_vm1, %v155_v58  ;;  %170 = vst.msk [vmem:[#allocation5 + $0x8] sm:$0xff] %vm168_vm1, %v153_v59 }
  0x92   :  { %v114_v62 = vpop.permute.xlu1 %113  ;;  %v112_v63 = vpop.permute.xlu0 %111 }
  0x93   :  { %v157_v0 = vsel %vm151_vm0, %v44_v60, %v114_v62  ;;  %v156_v1 = vsel %vm151_vm0, %v43_v61, %v112_v63 }
  0x94   :  { %174 = vst.msk [vmem:[#allocation5 + $0x28] sm:$0xff] %vm168_vm1, %v157_v0  ;;  %173 = vst.msk [vmem:[#allocation5 + $0x20] sm:$0xff] %vm168_vm1, %v156_v1 }
  0x96   :  { %v118_v4 = vpop.permute.xlu1 %117  ;;  %v116_v5 = vpop.permute.xlu0 %115 }
  0x97   :  { %v159_v6 = vsel %vm151_vm0, %v46_v2, %v118_v4  ;;  %v158_v7 = vsel %vm151_vm0, %v45_v3, %v116_v5 }
  0x98   :  { %176 = vst.msk [vmem:[#allocation5 + $0x38] sm:$0xff] %vm168_vm1, %v159_v6  ;;  %175 = vst.msk [vmem:[#allocation5 + $0x30] sm:$0xff] %vm168_vm1, %v158_v7 }
  0x9a   :  { %v122_v10 = vpop.permute.xlu1 %121  ;;  %v120_v11 = vpop.permute.xlu0 %119 }
  0x9b   :  { %v161_v12 = vsel %vm151_vm0, %v48_v8, %v122_v10  ;;  %v160_v13 = vsel %vm151_vm0, %v47_v9, %v120_v11 }
  0x9c   :  { %178 = vst.msk [vmem:[#allocation5 + $0x48] sm:$0xff] %vm168_vm1, %v161_v12  ;;  %177 = vst.msk [vmem:[#allocation5 + $0x40] sm:$0xff] %vm168_vm1, %v160_v13 }
  0x9e   :  { %v126_v16 = vpop.permute.xlu1 %125  ;;  %v124_v17 = vpop.permute.xlu0 %123 }
  0x9f   :  { %v163_v18 = vsel %vm151_vm0, %v50_v14, %v126_v16  ;;  %v162_v19 = vsel %vm151_vm0, %v49_v15, %v124_v17 }
  0xa0   :  { %180 = vst.msk [vmem:[#allocation5 + $0x58] sm:$0xff] %vm168_vm1, %v163_v18  ;;  %179 = vst.msk [vmem:[#allocation5 + $0x50] sm:$0xff] %vm168_vm1, %v162_v19 }
  0xa2   :  { %v130_v22 = vpop.permute.xlu1 %129  ;;  %v128_v23 = vpop.permute.xlu0 %127 }
  0xa3   :  { %v165_v24 = vsel %vm151_vm0, %v52_v20, %v130_v22  ;;  %v164_v25 = vsel %vm151_vm0, %v51_v21, %v128_v23 }
  0xa4   :  { %182 = vst.msk [vmem:[#allocation5 + $0x68] sm:$0xff] %vm168_vm1, %v165_v24  ;;  %181 = vst.msk [vmem:[#allocation5 + $0x60] sm:$0xff] %vm168_vm1, %v164_v25 }
  0xa6   :  { %v134_v28 = vpop.permute.xlu1 %133  ;;  %v132_v29 = vpop.permute.xlu0 %131 }
  0xa7   :  { %v167_v30 = vsel %vm151_vm0, %v54_v26, %v134_v28  ;;  %v166_v31 = vsel %vm151_vm0, %v53_v27, %v132_v29 }
  0xa8   :  { %184 = vst.msk [vmem:[#allocation5 + $0x78] sm:$0xff] %vm168_vm1, %v167_v30  ;;  %183 = vst.msk [vmem:[#allocation5 + $0x70] sm:$0xff] %vm168_vm1, %v166_v31 }
  0xa9   :  { %240 = shalt.err (!%p237_p12)
}
  0xaa   :  { %s241_s25 = scalar_lea.hbm %s413_s1, 2048 }
  0xab   :  { %p242_p13 = scmp.ne.s32.totalorder %s413_s1, %s241_s25  ;;  %p245_p0 = scmp.lt.u32.totalorder %s241_s25, %s413_s1 }
  0xad   :  { %p247_p1 = pnand %p245_p0, %p242_p13 }
  0xaf   :  { %250 = shalt.err (!%p247_p1)
}
  0xb0   :  { %196 = dma.vmem_to_hbm [thread:$0]  %s191_s21, 2048, %s413_s1, [#allocation4], %s256_s16, %s256_s16, %s257_s17  }
  0xb1   :  { %253 = dma.done.wait [#allocation4], 2048  }
  0xb2   :  { %254 = vsyncadd [#allocation4], 4294965248 }
  0xb3   :  { %200 = vsyncpa [#allocation3], 1 }
  0xb4   :  { %201 = vsyncpa [#allocation4], 1 }

</bundles_post_ra>
